<compile_context>
chip_gen: v6e
topology: v6e:2x2x1
jax: 0.10.0
libtpu: 0.0.40
codegen_flags: <defaults>
</compile_context>

<pallas_src>
import jax
import jax.numpy as jnp
from jax.experimental import pallas as pl
from jax.experimental.pallas import tpu as pltpu

BN_EPS = 1e-5


def _round_up(n: int, m: int) -> int:
    return ((n + m - 1) // m) * m


def _device_kind() -> str:
    try:
        return jax.devices()[0].device_kind.lower()
    except Exception:
        return ""


def _feature_lane_multiple() -> int:
    kind = _device_kind()
    if any(v in kind for v in ("v2", "v3", "v4", "v5")):
        return 128          # 128-wide MXU generations
    return 256              # v6e / v7x: 256-wide MXU -> avoid half-idle systolic array


def _vmem_cap_bytes(kind: str) -> int:
    if any(v in kind for v in ("v5", "v6")):
        return 100 * 2**20  # 128 MiB physical VMEM -> generous scoped budget
    return 48 * 2**20       # v7x: 64 MiB per TensorCore; unknown chips stay conservative


def _vmem_estimate(tk: int, Bp: int, Lh: int, Cp: int) -> int:
    x_tiles = 2 * Bp * tk * 4        # double-buffered f32 x tiles
    w1_tiles = 2 * tk * Lh * 2       # double-buffered bf16 W1^T tiles
    vectors = 2 * 2 * Lh * 4         # gamma / beta
    w2 = 2 * Lh * Cp * 2             # resident bf16 W2^T
    out = 2 * Bp * Cp * 4            # f32 output block
    acc = Bp * Lh * 4                # f32 accumulator scratch
    return x_tiles + w1_tiles + vectors + w2 + out + acc


def _pick_k_tile(Kp: int, k_tile_hint: int, Bp: int, Lh: int, Cp: int, vmem_cap: int) -> int:
    """Largest K tile (multiple of 128) that divides Kp exactly, respects the hint and fits VMEM."""
    base = Kp // 128
    best = 128
    for d in range(1, base + 1):
        if base % d != 0:
            continue
        tk = d * 128
        if tk > k_tile_hint:
            break
        if _vmem_estimate(tk, Bp, Lh, Cp) + (4 << 20) <= vmem_cap:
            best = tk
    return best


def _make_kernel(true_batch: int, padded_batch: int):
    def kernel(x_ref, w1t_ref, gamma_ref, beta_ref, w2t_ref, out_ref, acc_ref):
        # grid = (n_lp ["parallel" over Lp shards], nk ["arbitrary" reduction over K])
        k = pl.program_id(1)

        @pl.when(k == 0)
        def _():
            acc_ref[...] = jnp.zeros_like(acc_ref)

        # --- add_block Linear(input_dim -> linear), partial product on the MXU.
        # x arrives f32; cast the tile to bf16 in-kernel (hidden under the W1 DMA), accumulate f32.
        acc_ref[...] += jnp.dot(x_ref[...].astype(jnp.bfloat16), w1t_ref[...],
                                preferred_element_type=jnp.float32)

        @pl.when(k == pl.num_programs(1) - 1)
        def _():
            # Linear1 bias intentionally omitted: a per-column constant is cancelled exactly by
            # training-mode BatchNorm mean subtraction (this is the bnorm=True instantiation).
            h = acc_ref[...]                                   # (Bp, Lh) f32
            inv_b = 1.0 / true_batch

            # --- BatchNorm1d, training-mode batch statistics (two-pass, numerically robust) ---
            mean = jnp.sum(h, axis=0, keepdims=True) * inv_b   # zero-padded rows contribute nothing
            hc = h - mean
            if padded_batch != true_batch:                     # static (trace-time) branch
                rows = jax.lax.broadcasted_iota(jnp.int32, hc.shape, 0)
                hc = jnp.where(rows < true_batch, hc, 0.0)     # keep padded rows out of the variance
            var = jnp.sum(hc * hc, axis=0, keepdims=True) * inv_b   # biased variance, as PyTorch BN
            inv_std = jax.lax.rsqrt(var + BN_EPS)

            scale = gamma_ref[...] * inv_std                   # (1, Lh)
            h_bn = (hc * scale + beta_ref[...]).astype(jnp.bfloat16)

            # relu=False, droprate=0.0 in this instantiation -> no LeakyReLU, no Dropout.
            # TODO(synk): dropout (droprate>0, training) would need pltpu.prng_seed/prng_random_bits.

            # --- classifier Linear(linear -> class_num): partial product over this Lp shard ---
            out = jnp.dot(h_bn, w2t_ref[...], preferred_element_type=jnp.float32)
            out_ref[...] = out[None].astype(out_ref.dtype)
    return kernel


def prepare_class_block_params(params, *, lane_multiple=None):
    """One-time weight preparation (transpose / pad / bf16 cast), hoisted out of the forward pass."""
    if lane_multiple is None:
        lane_multiple = _feature_lane_multiple()
    linear, input_dim = params["w1"].shape
    class_num = params["w2"].shape[0]

    Kp = _round_up(input_dim, 128)
    Lp = _round_up(linear, lane_multiple)
    Cp = _round_up(class_num, lane_multiple)

    f32, bf16 = jnp.float32, jnp.bfloat16
    w1t = jnp.pad(params["w1"].T.astype(bf16), ((0, Kp - input_dim), (0, Lp - linear)))  # (Kp, Lp)
    gamma = jnp.pad(params["gamma"].astype(f32), (0, Lp - linear))[None, :]              # (1, Lp)
    beta = jnp.pad(params["beta"].astype(f32), (0, Lp - linear))[None, :]                # (1, Lp)
    w2t = jnp.pad(params["w2"].T.astype(bf16), ((0, Lp - linear), (0, Cp - class_num)))  # (Lp, Cp)
    b2 = jnp.pad(params["b2"].astype(f32), (0, Cp - class_num))[None, :]                 # (1, Cp)
    # NOTE: b1 is not prepared -- it is mathematically cancelled by training-mode BatchNorm.

    return {"w1t": w1t, "gamma": gamma, "beta": beta, "w2t": w2t, "b2": b2,
            "dims": (input_dim, linear, class_num, Kp, Lp, Cp)}


def class_block_forward(x, prepared, *, k_tile=1024, lp_splits=None):
    """x: (B, input_dim) float32. prepared: output of prepare_class_block_params."""
    input_dim, linear, class_num, Kp, Lp, Cp = prepared["dims"]
    B, D = x.shape
    assert D == input_dim, (D, input_dim)
    Bp = _round_up(B, 8)

    # x stays f32 (cast happens in-kernel); pad only when shapes demand it.
    if Bp != B or Kp != D:
        x_in = jnp.pad(x, ((0, Bp - B), (0, Kp - D)))
    else:
        x_in = x

    kind = _device_kind()
    n_lp = lp_splits if lp_splits is not None else (2 if ("v7" in kind or "7x" in kind) else 1)
    if n_lp < 1 or Lp % n_lp != 0 or (Lp // n_lp) % 128 != 0:
        n_lp = 1
    Lh = Lp // n_lp

    cap = _vmem_cap_bytes(kind)
    tk = _pick_k_tile(Kp, max(int(k_tile), 128), Bp, Lh, Cp, cap)
    nk = Kp // tk
    vmem_bytes = min(cap, max(32 * 2**20, _vmem_estimate(tk, Bp, Lh, Cp) + (4 << 20)))

    out_parts = pl.pallas_call(
        _make_kernel(B, Bp),
        out_shape=jax.ShapeDtypeStruct((n_lp, Bp, Cp), jnp.float32),
        grid_spec=pltpu.PrefetchScalarGridSpec(
            num_scalar_prefetch=0,
            grid=(n_lp, nk),
            in_specs=[
                pl.BlockSpec((Bp, tk), lambda l, k: (0, k)),   # x tile (f32, pipelined over K)
                pl.BlockSpec((tk, Lh), lambda l, k: (k, l)),   # W1^T shard tile (pipelined over K)
                pl.BlockSpec((1, Lh), lambda l, k: (0, l)),    # gamma shard (resident)
                pl.BlockSpec((1, Lh), lambda l, k: (0, l)),    # beta  shard (resident)
                pl.BlockSpec((Lh, Cp), lambda l, k: (l, 0)),   # W2^T  shard (resident)
            ],
            out_specs=pl.BlockSpec((1, Bp, Cp), lambda l, k: (l, 0, 0)),
            scratch_shapes=[pltpu.VMEM((Bp, Lh), jnp.float32)],   # h accumulator (per Lp shard)
        ),
        compiler_params=pltpu.CompilerParams(
            dimension_semantics=("parallel", "arbitrary"),     # Lp shards parallel, K is a reduction
            vmem_limit_bytes=int(vmem_bytes),
        ),
    )(x_in, prepared["w1t"], prepared["gamma"], prepared["beta"], prepared["w2t"])

    # Sum per-shard classifier partials, add the classifier bias once, drop padding.
    out = jnp.sum(out_parts, axis=0) + prepared["b2"]
    return out[:B, :class_num]


def init_class_block_params(key, input_dim, linear, class_num):
    """Matches ClassBlock's init schemes (torch weight layout (out_features, in_features)).
       Linear1: kaiming_normal_(mode='fan_out', a=0) -> std = sqrt(2 / linear), bias = 0
       BatchNorm1d: weight ~ N(1.0, 0.02), bias = 0
       Classifier Linear: weight ~ N(0, 0.001), bias = 0
    """
    k1, k2, k3 = jax.random.split(key, 3)
    std1 = (2.0 / linear) ** 0.5
    return {
        "w1": std1 * jax.random.normal(k1, (linear, input_dim), jnp.float32),
        "b1": jnp.zeros((linear,), jnp.float32),
        "gamma": 1.0 + 0.02 * jax.random.normal(k2, (linear,), jnp.float32),
        "beta": jnp.zeros((linear,), jnp.float32),
        "w2": 0.001 * jax.random.normal(k3, (class_num, linear), jnp.float32),
        "b2": jnp.zeros((class_num,), jnp.float32),
    }


def class_block_reference(x, p):
    """Pure-JAX reference mirroring the kernel's numerics (bf16 MXU inputs, f32 accumulation/BN).
       Includes +b1 (training-mode BN cancels it, so it matches the kernel that omits it)."""
    h = jnp.dot(x.astype(jnp.bfloat16), p["w1"].T.astype(jnp.bfloat16),
                preferred_element_type=jnp.float32) + p["b1"][None, :]
    mean = jnp.mean(h, axis=0, keepdims=True)
    var = jnp.mean((h - mean) ** 2, axis=0, keepdims=True)   # biased
    h = (h - mean) * jax.lax.rsqrt(var + BN_EPS) * p["gamma"][None, :] + p["beta"][None, :]
    return jnp.dot(h.astype(jnp.bfloat16), p["w2"].T.astype(jnp.bfloat16),
                   preferred_element_type=jnp.float32) + p["b2"][None, :]


if __name__ == "__main__":
    key = jax.random.PRNGKey(0)

    # Case 1: lane-aligned shapes (no x padding path); linear=256 so the Lp shard split is legal.
    B1, D1, L1, C1 = 8, 256, 256, 75
    k1, k2, key = jax.random.split(key, 3)
    x1 = jax.random.normal(k1, (B1, D1), jnp.float32)
    p1 = init_class_block_params(k2, D1, L1, C1)
    prep1 = prepare_class_block_params(p1)          # one-time weight prep (reused below)

    out1 = jax.block_until_ready(class_block_forward(x1, prep1))
    ref1 = class_block_reference(x1, p1)
    assert out1.shape == (B1, C1), out1.shape
    assert jnp.allclose(out1, ref1, atol=2e-3, rtol=2e-2), float(jnp.max(jnp.abs(out1 - ref1)))

    # Same case with the 2-way Lp split forced (the v7x cross-TensorCore path; correct on any chip).
    out1b = jax.block_until_ready(class_block_forward(x1, prep1, lp_splits=2))
    assert jnp.allclose(out1b, ref1, atol=2e-3, rtol=2e-2), float(jnp.max(jnp.abs(out1b - ref1)))

    # Case 2: ragged batch and unaligned feature dims exercise the batch/K/L/C padding paths.
    B2, D2, L2, C2 = 6, 100, 32, 16
    k3, k4, key = jax.random.split(key, 3)
    x2 = jax.random.normal(k3, (B2, D2), jnp.float32)
    p2 = init_class_block_params(k4, D2, L2, C2)
    prep2 = prepare_class_block_params(p2)
    out2 = jax.block_until_ready(class_block_forward(x2, prep2))
    ref2 = class_block_reference(x2, p2)
    assert out2.shape == (B2, C2), out2.shape
    assert jnp.allclose(out2, ref2, atol=2e-3, rtol=2e-2), float(jnp.max(jnp.abs(out2 - ref2)))

    print("KERNEL_OK")
</pallas_src>

<mosaic_0001>
module attributes {stable_mosaic.version = 11 : i64} {
  func.func @kernel(%arg0: i32, %arg1: i32, %arg2: memref<8x256xf32, #tpu.memory_space<vmem>>, %arg3: memref<256x256xbf16, #tpu.memory_space<vmem>>, %arg4: memref<1x256xf32, #tpu.memory_space<vmem>>, %arg5: memref<1x256xf32, #tpu.memory_space<vmem>>, %arg6: memref<256x256xbf16, #tpu.memory_space<vmem>>, %arg7: memref<1x8x256xf32, #tpu.memory_space<vmem>>, %arg8: memref<8x256xf32, #tpu.memory_space<vmem>>) attributes {dimension_semantics = [#tpu.dimension_semantics<parallel>, #tpu.dimension_semantics<arbitrary>], iteration_bounds = array<i64: 1, 1>, scalar_prefetch = 0 : i64, scratch_operands = 1 : i64, tpu.core_type = #tpu.core_type<tc>, window_params = [{transform_indices = @transform_0, window_bounds = array<i64: 8, 256>}, {transform_indices = @transform_1, window_bounds = array<i64: 256, 256>}, {transform_indices = @transform_2, window_bounds = array<i64: 1, 256>}, {transform_indices = @transform_3, window_bounds = array<i64: 1, 256>}, {transform_indices = @transform_4, window_bounds = array<i64: 256, 256>}, {transform_indices = @transform_5, window_bounds = array<i64: 1, 8, 256>}]} {
    %c0_i32 = arith.constant 0 : i32
    %0 = arith.cmpi eq, %arg1, %c0_i32 : i32
    %1 = arith.extui %0 : i1 to i32
    %c0_i32_0 = arith.constant 0 : i32
    %2 = arith.cmpi ne, %1, %c0_i32_0 : i32
    scf.if %2 {
      %cst_10 = arith.constant 0.000000e+00 : f32
      %13 = vector.broadcast %cst_10 : f32 to vector<8x256xf32>
      %c0_11 = arith.constant 0 : index
      %c0_12 = arith.constant 0 : index
      %14 = vector.load %arg8[%c0_11, %c0_12] : memref<8x256xf32, #tpu.memory_space<vmem>>, vector<8x256xf32>
      tpu.vector_store %arg8[%c0_11, %c0_12], %13 {strides = array<i32>} : memref<8x256xf32, #tpu.memory_space<vmem>>, vector<8x256xf32>,
    } else {
    }
    %c0 = arith.constant 0 : index
    %c0_1 = arith.constant 0 : index
    %3 = vector.load %arg8[%c0, %c0_1] : memref<8x256xf32, #tpu.memory_space<vmem>>, vector<8x256xf32>
    %c0_2 = arith.constant 0 : index
    %c0_3 = arith.constant 0 : index
    %4 = vector.load %arg2[%c0_2, %c0_3] : memref<8x256xf32, #tpu.memory_space<vmem>>, vector<8x256xf32>
    %5 = arith.truncf %4 : vector<8x256xf32> to vector<8x256xbf16>
    %c0_4 = arith.constant 0 : index
    %c0_5 = arith.constant 0 : index
    %6 = vector.load %arg3[%c0_4, %c0_5] : memref<256x256xbf16, #tpu.memory_space<vmem>>, vector<256x256xbf16>
    %cst = arith.constant dense<0.000000e+00> : vector<8x256xf32>
    %7 = tpu.matmul %5, %6, %cst {dimension_numbers = #tpu.dot_dimension_numbers<[1], [0], [0], [1], [0, 0, 1, 1], [], []>} : vector<8x256xbf16>, vector<256x256xbf16>, vector<8x256xf32> -> vector<8x256xf32>
    %8 = arith.addf %3, %7 : vector<8x256xf32>
    %c0_6 = arith.constant 0 : index
    %c0_7 = arith.constant 0 : index
    %9 = vector.load %arg8[%c0_6, %c0_7] : memref<8x256xf32, #tpu.memory_space<vmem>>, vector<8x256xf32>
    tpu.vector_store %arg8[%c0_6, %c0_7], %8 {strides = array<i32>} : memref<8x256xf32, #tpu.memory_space<vmem>>, vector<8x256xf32>,
    %c0_i32_8 = arith.constant 0 : i32
    %10 = arith.cmpi eq, %arg1, %c0_i32_8 : i32
    %11 = arith.extui %10 : i1 to i32
    %c0_i32_9 = arith.constant 0 : i32
    %12 = arith.cmpi ne, %11, %c0_i32_9 : i32
    scf.if %12 {
      %c0_10 = arith.constant 0 : index
      %c0_11 = arith.constant 0 : index
      %13 = vector.load %arg8[%c0_10, %c0_11] : memref<8x256xf32, #tpu.memory_space<vmem>>, vector<8x256xf32>
      %cst_12 = arith.constant dense<0.000000e+00> : vector<256xf32>
      %14 = vector.multi_reduction <add>, %13, %cst_12 [0] : vector<8x256xf32> to vector<256xf32>
      %15 = vector.shape_cast %14 : vector<256xf32> to vector<1x256xf32>
      %cst_13 = arith.constant 1.250000e-01 : f32
      %16 = vector.broadcast %cst_13 : f32 to vector<1x256xf32>
      %17 = arith.mulf %15, %16 : vector<1x256xf32>
      %18 = vector.broadcast %17 : vector<1x256xf32> to vector<8x256xf32>
      %19 = arith.subf %13, %18 : vector<8x256xf32>
      %20 = arith.mulf %19, %19 : vector<8x256xf32>
      %cst_14 = arith.constant dense<0.000000e+00> : vector<256xf32>
      %21 = vector.multi_reduction <add>, %20, %cst_14 [0] : vector<8x256xf32> to vector<256xf32>
      %22 = vector.shape_cast %21 : vector<256xf32> to vector<1x256xf32>
      %cst_15 = arith.constant 1.250000e-01 : f32
      %23 = vector.broadcast %cst_15 : f32 to vector<1x256xf32>
      %24 = arith.mulf %22, %23 : vector<1x256xf32>
      %cst_16 = arith.constant 9.99999974E-6 : f32
      %25 = vector.broadcast %cst_16 : f32 to vector<1x256xf32>
      %26 = arith.addf %24, %25 : vector<1x256xf32>
      %27 = math.rsqrt %26 : vector<1x256xf32>
      %c0_17 = arith.constant 0 : index
      %c0_18 = arith.constant 0 : index
      %28 = vector.load %arg4[%c0_17, %c0_18] : memref<1x256xf32, #tpu.memory_space<vmem>>, vector<1x256xf32>
      %29 = arith.mulf %28, %27 : vector<1x256xf32>
      %30 = vector.broadcast %29 : vector<1x256xf32> to vector<8x256xf32>
      %31 = arith.mulf %19, %30 : vector<8x256xf32>
      %c0_19 = arith.constant 0 : index
      %c0_20 = arith.constant 0 : index
      %32 = vector.load %arg5[%c0_19, %c0_20] : memref<1x256xf32, #tpu.memory_space<vmem>>, vector<1x256xf32>
      %33 = vector.broadcast %32 : vector<1x256xf32> to vector<8x256xf32>
      %34 = arith.addf %31, %33 : vector<8x256xf32>
      %35 = arith.truncf %34 : vector<8x256xf32> to vector<8x256xbf16>
      %c0_21 = arith.constant 0 : index
      %c0_22 = arith.constant 0 : index
      %36 = vector.load %arg6[%c0_21, %c0_22] : memref<256x256xbf16, #tpu.memory_space<vmem>>, vector<256x256xbf16>
      %cst_23 = arith.constant dense<0.000000e+00> : vector<8x256xf32>
      %37 = tpu.matmul %35, %36, %cst_23 {dimension_numbers = #tpu.dot_dimension_numbers<[1], [0], [0], [1], [0, 0, 1, 1], [], []>} : vector<8x256xbf16>, vector<256x256xbf16>, vector<8x256xf32> -> vector<8x256xf32>
      %38 = vector.shape_cast %37 : vector<8x256xf32> to vector<1x8x256xf32>
      %c0_24 = arith.constant 0 : index
      %c0_25 = arith.constant 0 : index
      %c0_26 = arith.constant 0 : index
      %39 = vector.load %arg7[%c0_24, %c0_25, %c0_26] : memref<1x8x256xf32, #tpu.memory_space<vmem>>, vector<1x8x256xf32>
      tpu.vector_store %arg7[%c0_24, %c0_25, %c0_26], %38 {strides = array<i32>} : memref<1x8x256xf32, #tpu.memory_space<vmem>>, vector<1x8x256xf32>,
    } else {
    }
    return
  }
  func.func @transform_0(%arg0: i32, %arg1: i32) -> (i32, i32) {
    %c0_i32 = arith.constant 0 : i32
    %c0_i32_0 = arith.constant 0 : i32
    return %c0_i32, %arg1 : i32, i32
  }
  func.func @transform_1(%arg0: i32, %arg1: i32) -> (i32, i32) {
    %c0_i32 = arith.constant 0 : i32
    return %arg1, %arg0 : i32, i32
  }
  func.func @transform_2(%arg0: i32, %arg1: i32) -> (i32, i32) {
    %c0_i32 = arith.constant 0 : i32
    %c0_i32_0 = arith.constant 0 : i32
    return %c0_i32, %arg0 : i32, i32
  }
  func.func @transform_3(%arg0: i32, %arg1: i32) -> (i32, i32) {
    %c0_i32 = arith.constant 0 : i32
    %c0_i32_0 = arith.constant 0 : i32
    return %c0_i32, %arg0 : i32, i32
  }
  func.func @transform_4(%arg0: i32, %arg1: i32) -> (i32, i32) {
    %c0_i32 = arith.constant 0 : i32
    %c0_i32_0 = arith.constant 0 : i32
    return %arg0, %c0_i32 : i32, i32
  }
  func.func @transform_5(%arg0: i32, %arg1: i32) -> (i32, i32, i32) {
    %c0_i32 = arith.constant 0 : i32
    %c0_i32_0 = arith.constant 0 : i32
    %c0_i32_1 = arith.constant 0 : i32
    return %arg0, %c0_i32, %c0_i32_0 : i32, i32, i32
  }
}

</mosaic_0001>

<bundles_post_ra>
// kernel: tpu_custom_call.1
= control target key start
LH: loop header
LB: loop body
LE: loop exit
PB: predicated region body
PF: predicated region fallthrough
CT: control target
= control target key end

     0   :  { %10 = vsyncpa [#allocation4], 0  ;;  %s962_s0 = inlined_call_operand.hbm [shape: f32[8,256], index: 0, kind: input, shape index: {}]   ;;  %s963_s1 = inlined_call_operand.hbm [shape: bf16[256,256], index: 1, kind: input, shape index: {}]   ;;  %s964_s2 = inlined_call_operand.vmem [shape: f32[1,256], index: 2, kind: input, shape index: {}]   ;;  %s965_s3 = inlined_call_operand.vmem [shape: f32[1,256], index: 3, kind: input, shape index: {}]   ;;  %s966_s4 = inlined_call_operand.hbm [shape: bf16[256,256], index: 4, kind: input, shape index: {}]   ;;  %s967_s5 = inlined_call_operand.hbm [shape: f32[1,8,256], index: 5, kind: output, shape index: {}]  }
   0x1   :  { %11 = vsyncpa [#allocation7], 0 }
   0x2   :  { %12 = vsyncpa [#allocation5], 0  ;;  %s907_s18 = smov [#allocation6]  }
   0x3   :  { %s28_s19 = sshll.u32 %s907_s18, 4  ;;  %s29_s19 = int_to_ptr.vmem [resolvable:$true] %s28_s19 }
   0x4   :  { %s829_s20 = scalar_lea.vmem %s29_s19, 4096  ;;  %p834_p1 = scmp.lt.s32.totalorder %s29_s19, %s29_s19 }
   0x5   :  { %p830_p0 = scmp.ne.s32.totalorder %s29_s19, %s829_s20  ;;  %p835_p2 = scmp.lt.s32.totalorder %s829_s20, %s829_s20 }
   0x7   :  { %p836_p3 = por %p835_p2, %p834_p1 }
   0x9   :  { %p837_p4 = pnand %p836_p3, %p830_p0 }
   0xb   :  { %840 = shalt.err (!%p837_p4)
}
   0xc   :  { %s908_s21 = smov 128   ;;  %s909_s22 = smov 8  }
   0xd   :  { %34 = dma.hbm_to_vmem [thread:$0]  %s963_s1, 4096, %s29_s19, [#allocation7], %s908_s21, %s908_s21, %s909_s22  }
   0xe   :  { %s910_s25 = smov [#allocation3]   ;;  %s911_s27 = smov [#allocation8]  }
   0xf   :  { %s19_s26 = sshll.u32 %s910_s25, 4  ;;  %s44_s28 = sshll.u32 %s911_s27, 4  ;;  %s20_s26 = int_to_ptr.vmem [resolvable:$true] %s19_s26  ;;  %s45_s28 = int_to_ptr.vmem [resolvable:$true] %s44_s28 }
  0x10   :  { %s849_s29 = scalar_lea.vmem %s20_s26, 256  ;;  %p854_p6 = scmp.lt.s32.totalorder %s20_s26, %s20_s26 }
  0x11   :  { %p850_p5 = scmp.ne.s32.totalorder %s20_s26, %s849_s29  ;;  %p855_p7 = scmp.lt.s32.totalorder %s849_s29, %s849_s29 }
  0x13   :  { %p856_p8 = por %p855_p7, %p854_p6 }
  0x15   :  { %p857_p9 = pnand %p856_p8, %p850_p5 }
  0x17   :  { %860 = shalt.err (!%p857_p9)
}
  0x18   :  { %22 = dma.hbm_to_vmem [thread:$0]  %s962_s0, 256, %s20_s26, [#allocation4]  }
  0x19   :  { %s869_s7 = scalar_lea.vmem %s45_s28, 4096  ;;  %p874_p11 = scmp.lt.s32.totalorder %s45_s28, %s45_s28 }
  0x1a   :  { %p870_p10 = scmp.ne.s32.totalorder %s45_s28, %s869_s7  ;;  %p875_p12 = scmp.lt.s32.totalorder %s869_s7, %s869_s7 }
  0x1c   :  { %p876_p13 = por %p875_p12, %p874_p11 }
  0x1e   :  { %p877_p0 = pnand %p876_p13, %p870_p10 }
  0x20   :  { %880 = shalt.err (!%p877_p0)
}
  0x21   :  { %50 = dma.hbm_to_vmem [thread:$0]  %s966_s4, 4096, %s45_s28, [#allocation7], %s908_s21, %s908_s21, %s909_s22  }
  0x22   :  { %901 = dma.done.wait [#allocation4], 256  }
  0x23   :  { %902 = vsyncadd [#allocation4], 4294967040 }
  0x24   :  { %903 = dma.done.wait [#allocation7], 8192  }
  0x25   :  { %904 = vsyncadd [#allocation7], 4294959104  ;;  %v721_v0 = vld [vmem:[#allocation6 + $0x74] ss:$8 sps:$4 sm:$0xff]   ;;  %v723_v1 = vld [vmem:[#allocation6 + $0x70] ss:$8 sps:$4 sm:$0xff]  }
  0x26   :  { %264 = vmatprep.subr.bf16.mxu0 %v721_v0  ;;  %v724_v2 = vld [vmem:[#allocation6 + $0x64] ss:$8 sps:$4 sm:$0xff]   ;;  %v726_v3 = vld [vmem:[#allocation6 + $0x60] ss:$8 sps:$4 sm:$0xff]   ;;  %v727_v4 = vld [vmem:[#allocation6 + $0x54] ss:$8 sps:$4 sm:$0xff]  }
  0x27   :  { %265 = vmatpush1.bf16.msra.mxu0 %v723_v1  ;;  %v729_v5 = vld [vmem:[#allocation6 + $0x50] ss:$8 sps:$4 sm:$0xff]   ;;  %v730_v6 = vld [vmem:[#allocation6 + $0x44] ss:$8 sps:$4 sm:$0xff]   ;;  %v732_v7 = vld [vmem:[#allocation6 + $0x40] ss:$8 sps:$4 sm:$0xff]  }
  0x28   :  { %266 = vmatprep.subr.bf16.mxu0 %v724_v2  ;;  %v733_v8 = vld [vmem:[#allocation6 + $0x34] ss:$8 sps:$4 sm:$0xff]   ;;  %v735_v9 = vld [vmem:[#allocation6 + $0x30] ss:$8 sps:$4 sm:$0xff]   ;;  %v736_v10 = vld [vmem:[#allocation6 + $0x24] ss:$8 sps:$4 sm:$0xff]  }
  0x29   :  { %v738_v11 = vld [vmem:[#allocation6 + $0x20] ss:$8 sps:$4 sm:$0xff]   ;;  %v739_v12 = vld [vmem:[#allocation6 + $0x14] ss:$8 sps:$4 sm:$0xff]   ;;  %v741_v13 = vld [vmem:[#allocation6 + $0x10] ss:$8 sps:$4 sm:$0xff]  }
  0x2a   :  { %v69_v14 = vld [vmem:[#allocation3 + $0x8] sm:$0xff]  ;;  %v742_v15 = vld [vmem:[#allocation6 + $0x4] ss:$8 sps:$4 sm:$0xff]   ;;  %v744_v17 = vld [vmem:[#allocation6] ss:$8 sps:$4 sm:$0xff]  }
  0x2b   :  { %267 = vmatpush1.bf16.msra.mxu0 %v726_v3  ;;  %v71_v16 = vpack.c.bf16 %v69_v14, %v69_v14  ;;  %v745_v18 = vld [vmem:[#allocation6 + $0xf4] ss:$8 sps:$4 sm:$0xff]   ;;  %v747_v19 = vld [vmem:[#allocation6 + $0xf0] ss:$8 sps:$4 sm:$0xff]   ;;  %v748_v20 = vld [vmem:[#allocation6 + $0xe4] ss:$8 sps:$4 sm:$0xff]  }
  0x2c   :  { %268 = vmatprep.subr.bf16.mxu0 %v727_v4  ;;  %v750_v21 = vld [vmem:[#allocation6 + $0xe0] ss:$8 sps:$4 sm:$0xff]   ;;  %v751_v22 = vld [vmem:[#allocation6 + $0xd4] ss:$8 sps:$4 sm:$0xff]   ;;  %v753_v23 = vld [vmem:[#allocation6 + $0xd0] ss:$8 sps:$4 sm:$0xff]  }
  0x2d   :  { %296 = vmatprep.mubr.bf16.mxu0 %v71_v16  ;;  %v754_v24 = vld [vmem:[#allocation6 + $0xc4] ss:$8 sps:$4 sm:$0xff]   ;;  %v756_v25 = vld [vmem:[#allocation6 + $0xc0] ss:$8 sps:$4 sm:$0xff]   ;;  %v757_v26 = vld [vmem:[#allocation6 + $0xb4] ss:$8 sps:$4 sm:$0xff]  }
  0x2e   :  { %v759_v27 = vld [vmem:[#allocation6 + $0xb0] ss:$8 sps:$4 sm:$0xff]   ;;  %v760_v28 = vld [vmem:[#allocation6 + $0xa4] ss:$8 sps:$4 sm:$0xff]   ;;  %v762_v29 = vld [vmem:[#allocation6 + $0xa0] ss:$8 sps:$4 sm:$0xff]  }
  0x2f   :  { %269 = vmatpush1.bf16.msra.mxu0 %v729_v5  ;;  %v763_v30 = vld [vmem:[#allocation6 + $0x94] ss:$8 sps:$4 sm:$0xff]   ;;  %v765_v31 = vld [vmem:[#allocation6 + $0x90] ss:$8 sps:$4 sm:$0xff]   ;;  %v766_v32 = vld [vmem:[#allocation6 + $0x84] ss:$8 sps:$4 sm:$0xff]  }
  0x30   :  { %270 = vmatprep.subr.bf16.mxu0 %v730_v6  ;;  %v768_v33 = vld [vmem:[#allocation6 + $0x80] ss:$8 sps:$4 sm:$0xff]   ;;  %v68_v34 = vld [vmem:[#allocation3] sm:$0xff]  ;;  %v772_v38 = vld [vmem:[#allocation8 + $0x64] ss:$8 sps:$4 sm:$0xff]  }
  0x31   :  { %v70_v35 = vpack.c.bf16 %v68_v34, %v68_v34  ;;  %v769_v36 = vld [vmem:[#allocation8 + $0x74] ss:$8 sps:$4 sm:$0xff]   ;;  %v771_v37 = vld [vmem:[#allocation8 + $0x70] ss:$8 sps:$4 sm:$0xff]   ;;  %v774_v39 = vld [vmem:[#allocation8 + $0x60] ss:$8 sps:$4 sm:$0xff]  }
  0x32   :  { %591 = vmatprep.subr.bf16.mxu1 %v769_v36  ;;  %v775_v40 = vld [vmem:[#allocation8 + $0x54] ss:$8 sps:$4 sm:$0xff]   ;;  %v777_v41 = vld [vmem:[#allocation8 + $0x50] ss:$8 sps:$4 sm:$0xff]   ;;  %v778_v42 = vld [vmem:[#allocation8 + $0x44] ss:$8 sps:$4 sm:$0xff]  }
  0x33   :  { %271 = vmatpush1.bf16.msra.mxu0 %v732_v7  ;;  %592 = vmatpush1.bf16.msra.mxu1 %v771_v37  ;;  %v780_v43 = vld [vmem:[#allocation8 + $0x40] ss:$8 sps:$4 sm:$0xff]   ;;  %v781_v44 = vld [vmem:[#allocation8 + $0x34] ss:$8 sps:$4 sm:$0xff]   ;;  %v783_v45 = vld [vmem:[#allocation8 + $0x30] ss:$8 sps:$4 sm:$0xff]  }
  0x34   :  { %272 = vmatprep.subr.bf16.mxu0 %v733_v8  ;;  %593 = vmatprep.subr.bf16.mxu1 %v772_v38  ;;  %v784_v46 = vld [vmem:[#allocation8 + $0x24] ss:$8 sps:$4 sm:$0xff]   ;;  %v786_v47 = vld [vmem:[#allocation8 + $0x20] ss:$8 sps:$4 sm:$0xff]   ;;  %v787_v48 = vld [vmem:[#allocation8 + $0x14] ss:$8 sps:$4 sm:$0xff]  }
  0x35   :  { %v789_v49 = vld [vmem:[#allocation8 + $0x10] ss:$8 sps:$4 sm:$0xff]   ;;  %v790_v50 = vld [vmem:[#allocation8 + $0x4] ss:$8 sps:$4 sm:$0xff]   ;;  %v792_v51 = vld [vmem:[#allocation8] ss:$8 sps:$4 sm:$0xff]  }
  0x36   :  { %v793_v52 = vld [vmem:[#allocation8 + $0xf4] ss:$8 sps:$4 sm:$0xff]   ;;  %v795_v53 = vld [vmem:[#allocation8 + $0xf0] ss:$8 sps:$4 sm:$0xff]   ;;  %v796_v54 = vld [vmem:[#allocation8 + $0xe4] ss:$8 sps:$4 sm:$0xff]  }
  0x37   :  { %273 = vmatpush1.bf16.msra.mxu0 %v735_v9  ;;  %594 = vmatpush1.bf16.msra.mxu1 %v774_v39  ;;  %v798_v55 = vld [vmem:[#allocation8 + $0xe0] ss:$8 sps:$4 sm:$0xff]   ;;  %v799_v56 = vld [vmem:[#allocation8 + $0xd4] ss:$8 sps:$4 sm:$0xff]   ;;  %v801_v57 = vld [vmem:[#allocation8 + $0xd0] ss:$8 sps:$4 sm:$0xff]  }
  0x38   :  { %274 = vmatprep.subr.bf16.mxu0 %v736_v10  ;;  %595 = vmatprep.subr.bf16.mxu1 %v775_v40  ;;  %v802_v58 = vld [vmem:[#allocation8 + $0xc4] ss:$8 sps:$4 sm:$0xff]   ;;  %v804_v59 = vld [vmem:[#allocation8 + $0xc0] ss:$8 sps:$4 sm:$0xff]   ;;  %v805_v60 = vld [vmem:[#allocation8 + $0xb4] ss:$8 sps:$4 sm:$0xff]  }
  0x39   :  { %v807_v61 = vld [vmem:[#allocation8 + $0xb0] ss:$8 sps:$4 sm:$0xff]   ;;  %v808_v62 = vld [vmem:[#allocation8 + $0xa4] ss:$8 sps:$4 sm:$0xff]   ;;  %v810_v63 = vld [vmem:[#allocation8 + $0xa0] ss:$8 sps:$4 sm:$0xff]  }
  0x3a   :  { %v811_v0 = vld [vmem:[#allocation8 + $0x94] ss:$8 sps:$4 sm:$0xff]   ;;  %v813_v1 = vld [vmem:[#allocation8 + $0x90] ss:$8 sps:$4 sm:$0xff]   ;;  %v814_v2 = vld [vmem:[#allocation8 + $0x84] ss:$8 sps:$4 sm:$0xff]  }
  0x3b   :  { %275 = vmatpush1.bf16.msra.mxu0 %v738_v11  ;;  %596 = vmatpush1.bf16.msra.mxu1 %v777_v41  ;;  %v816_v3 = vld [vmem:[#allocation8 + $0x80] ss:$8 sps:$4 sm:$0xff]  }
  0x3c   :  { %276 = vmatprep.subr.bf16.mxu0 %v739_v12  ;;  %597 = vmatprep.subr.bf16.mxu1 %v778_v42  ;;  %v912_v42 = vmov 1966171168  }
  0x3f   :  { %277 = vmatpush1.bf16.msra.mxu0 %v741_v13  ;;  %598 = vmatpush1.bf16.msra.mxu1 %v780_v43  ;;  %v355_v43 = vunpack.c.l.s4 %v912_v42 }
  0x40   :  { %278 = vmatprep.subr.bf16.mxu0 %v742_v15  ;;  %599 = vmatprep.subr.bf16.mxu1 %v781_v44  ;;  %v357_v44 = vlaneseq }
  0x43   :  { %279 = vmatpush1.bf16.msra.mxu0 %v744_v17  ;;  %600 = vmatpush1.bf16.msra.mxu1 %v783_v45  ;;  %v356_v45 = vunpack.c.0.s8 %v355_v43 }
  0x44   :  { %280 = vmatprep.subr.bf16.mxu0 %v745_v18  ;;  %601 = vmatprep.subr.bf16.mxu1 %v784_v46  ;;  %v358_v46 = vshrl.u32 %v357_v44, 7 }
  0x47   :  { %281 = vmatpush2.bf16.msra.mxu0 %v747_v19  ;;  %602 = vmatpush1.bf16.msra.mxu1 %v786_v47 }
  0x48   :  { %282 = vmatprep.subr.bf16.mxu0 %v748_v20  ;;  %603 = vmatprep.subr.bf16.mxu1 %v787_v48  ;;  %v359_v48 = vsub.s32 %v356_v45, %v358_v46 }
  0x4b   :  { %283 = vmatpush2.bf16.msra.mxu0 %v750_v21  ;;  %604 = vmatpush1.bf16.msra.mxu1 %v789_v49 }
  0x4c   :  { %284 = vmatprep.subr.bf16.mxu0 %v751_v22  ;;  %605 = vmatprep.subr.bf16.mxu1 %v790_v50 }
  0x4f   :  { %285 = vmatpush2.bf16.msra.mxu0 %v753_v23  ;;  %606 = vmatpush1.bf16.msra.mxu1 %v792_v51 }
  0x50   :  { %286 = vmatprep.subr.bf16.mxu0 %v754_v24  ;;  %607 = vmatprep.subr.bf16.mxu1 %v793_v52  ;;  %v350_v52 = vld [vmem:[%s964_s2] sm:$0x3]  ;;  %s913_s2 = smov [#allocation9]  }
  0x51   :  { %s640_s11 = sshll.u32 %s913_s2, 4  ;;  %s641_s11 = int_to_ptr.vmem [resolvable:$true] %s640_s11 }
  0x52   :  { %p886_p2 = scmp.lt.s32.totalorder %s641_s11, %s641_s11 }
  0x53   :  { %287 = vmatpush2.bf16.msra.mxu0 %v756_v25  ;;  %608 = vmatpush2.bf16.msra.mxu1 %v795_v53 }
  0x54   :  { %288 = vmatprep.subr.bf16.mxu0 %v757_v26  ;;  %609 = vmatprep.subr.bf16.mxu1 %v796_v54  ;;  %v373_v54 = vsub.s32 0, %v358_v46 }
  0x57   :  { %289 = vmatpush2.bf16.msra.mxu0 %v759_v27  ;;  %610 = vmatpush2.bf16.msra.mxu1 %v798_v55  ;;  %v377_v55 = vsub.s32 1, %v358_v46 }
  0x58   :  { %290 = vmatprep.subr.bf16.mxu0 %v760_v28  ;;  %611 = vmatprep.subr.bf16.mxu1 %v799_v56  ;;  %v383_v56 = vld [vmem:[%s965_s3] sm:$0x3]  ;;  %s881_s3 = scalar_lea.vmem %s641_s11, 256 }
  0x59   :  { %p882_p1 = scmp.ne.s32.totalorder %s641_s11, %s881_s3  ;;  %p887_p3 = scmp.lt.s32.totalorder %s881_s3, %s881_s3 }
  0x5b   :  { %291 = vmatpush2.bf16.msra.mxu0 %v762_v29  ;;  %612 = vmatpush2.bf16.msra.mxu1 %v801_v57  ;;  %p888_p4 = por %p887_p3, %p886_p2 }
  0x5c   :  { %292 = vmatprep.subr.bf16.mxu0 %v763_v30  ;;  %613 = vmatprep.subr.bf16.mxu1 %v802_v58 }
  0x5d   :  { %p889_p5 = pnand %p888_p4, %p882_p1 }
  0x5f   :  { %293 = vmatpush2.bf16.msra.mxu0 %v765_v31  ;;  %614 = vmatpush2.bf16.msra.mxu1 %v804_v59  ;;  %v388_v59 = vrot.slane %v383_v56, %v373_v54 }
  0x60   :  { %294 = vmatprep.subr.bf16.mxu0 %v766_v32  ;;  %615 = vmatprep.subr.bf16.mxu1 %v805_v60  ;;  %v392_v60 = vrot.slane %v383_v56, %v377_v55 }
  0x63   :  { %295 = vmatpush2.bf16.msra.mxu0 %v768_v33  ;;  %616 = vmatpush2.bf16.msra.mxu1 %v807_v61 }
  0x64   :  { %617 = vmatprep.subr.bf16.mxu1 %v808_v62 }
  0x66   :  { %297 = vmatmul.mubr.bf16.vlgmr.msra.gmra.mxu0 %v70_v35 }
  0x67   :  { %618 = vmatpush2.bf16.msra.mxu1 %v810_v63 }
  0x68   :  { %619 = vmatprep.subr.bf16.mxu1 %v811_v0 }
  0x6b   :  { %620 = vmatpush2.bf16.msra.mxu1 %v813_v1 }
  0x6c   :  { %621 = vmatprep.subr.bf16.mxu1 %v814_v2 }
  0x6f   :  { %622 = vmatpush2.bf16.msra.mxu1 %v816_v3 }
 0x126   :  { %v298_v4 = vpop.f32.mrf.mxu0 }
 0x127   :  { %v314_v5 = vrot.slane %v298_v4, 4 }
 0x128   :  { %v300_v6 = vpop.f32.mrf.mxu0 }
 0x129   :  { %v315_v7 = vadd.f32 %v314_v5, %v298_v4  ;;  %v320_v8 = vrot.slane %v300_v6, 4 }
 0x12a   :  { %v302_v9 = vpop.f32.mrf.mxu0 }
 0x12b   :  { %v316_v10 = vrot.slane %v315_v7, 2  ;;  %v321_v11 = vadd.f32 %v320_v8, %v300_v6 }
 0x12c   :  { %v303_v12 = vpop.f32.mrf.mxu0 }
 0x12d   :  { %v317_v13 = vadd.f32 %v316_v10, %v315_v7  ;;  %v322_v14 = vrot.slane %v321_v11, 2 }
 0x12f   :  { %v318_v15 = vrot.slane %v317_v13, 1  ;;  %v323_v16 = vadd.f32 %v322_v14, %v321_v11 }
 0x131   :  { %v319_v17 = vadd.f32 %v318_v15, %v317_v13  ;;  %v324_v18 = vrot.slane %v323_v16, 1 }
 0x133   :  { %v326_v19 = vmul.f32 0.125, %v319_v17  ;;  %v325_v20 = vadd.f32 %v324_v18, %v323_v16 }
 0x135   :  { %v328_v21 = vsub.f32 %v298_v4, %v326_v19  ;;  %v327_v22 = vmul.f32 0.125, %v325_v20 }
 0x137   :  { %v330_v23 = vmul.f32 %v328_v21, %v328_v21  ;;  %v329_v24 = vsub.f32 %v300_v6, %v327_v22 }
 0x139   :  { %v332_v25 = vrot.slane %v330_v23, 4  ;;  %v331_v26 = vmul.f32 %v329_v24, %v329_v24 }
 0x13b   :  { %v333_v27 = vadd.f32 %v332_v25, %v330_v23  ;;  %v338_v28 = vrot.slane %v331_v26, 4 }
 0x13d   :  { %v334_v29 = vrot.slane %v333_v27, 2  ;;  %v339_v30 = vadd.f32 %v338_v28, %v331_v26 }
 0x13f   :  { %v335_v31 = vadd.f32 %v334_v29, %v333_v27  ;;  %v340_v32 = vrot.slane %v339_v30, 2 }
 0x141   :  { %v336_v33 = vrot.slane %v335_v31, 1  ;;  %v341_v34 = vadd.f32 %v340_v32, %v339_v30 }
 0x143   :  { %v337_v35 = vadd.f32 %v336_v33, %v335_v31  ;;  %v342_v36 = vrot.slane %v341_v34, 1 }
 0x145   :  { %v344_v37 = vmul.f32 0.125, %v337_v35  ;;  %v343_v38 = vadd.f32 %v342_v36, %v341_v34 }
 0x147   :  { %v346_v39 = vadd.f32 1e-05, %v344_v37  ;;  %v345_v40 = vmul.f32 0.125, %v343_v38 }
 0x149   :  { %v347_v41 = vadd.f32 1e-05, %v345_v40  ;;  %817 = vrsqrt.f32 %v346_v39 }
 0x14b   :  { %819 = vrsqrt.f32 %v347_v41 }
 0x156   :  { %v818_v47 = vpop.eup %817 }
 0x158   :  { %v820_v49 = vpop.eup %819 }
 0x159   :  { %v353_v50 = vcombine.low %v818_v47, %v820_v49 }
 0x15b   :  { %v360_v51 = vrot.slane %v353_v50, %v359_v48 }
 0x15d   :  { %v367_v53 = vrot.slane %v360_v51, %v359_v48 }
 0x15f   :  { %v369_v57 = vmul.f32 %v367_v53, %v350_v52 }
 0x161   :  { %v378_v58 = vrot.slane %v369_v57, %v377_v55  ;;  %v374_v61 = vrot.slane %v369_v57, %v373_v54 }
 0x163   :  { %v382_v62 = vmul.f32 %v378_v58, %v329_v24  ;;  %v381_v63 = vmul.f32 %v374_v61, %v328_v21 }
 0x165   :  { %v396_v0 = vadd.f32 %v392_v60, %v382_v62  ;;  %v395_v1 = vadd.f32 %v388_v59, %v381_v63 }
 0x167   :  { %v398_v2 = vpack.c.bf16 %v396_v0, %v396_v0  ;;  %v397_v3 = vpack.c.bf16 %v395_v1, %v395_v1 }
 0x169   :  { %623 = vmatprep.mubr.bf16.mxu1 %v398_v2 }
 0x16a   :  { %624 = vmatmul.mubr.bf16.vlgmr.msra.gmra.mxu1 %v397_v3 }
 0x22a   :  { %v625_v4 = vpop.f32.mrf.mxu1 }
 0x22b   :  { %632 = vst [vmem:[#allocation9] sm:$0xff] %v625_v4 }
 0x22c   :  { %v627_v5 = vpop.f32.mrf.mxu1 }
 0x22d   :  { %633 = vst [vmem:[#allocation9 + $0x8] sm:$0xff] %v627_v5 }
 0x22e   :  { %v629_v6 = vpop.f32.mrf.mxu1 }
 0x22f   :  { %892 = shalt.err (!%p889_p5)
}
 0x230   :  { %643 = dma.vmem_to_hbm [thread:$0]  %s641_s11, 256, %s967_s5, [#allocation5]   ;;  %v630_v7 = vpop.f32.mrf.mxu1 }
 0x231   :  { %905 = dma.done.wait [#allocation5], 256  }
 0x232   :  { %906 = vsyncadd [#allocation5], 4294967040 }
 0x233   :  { %647 = vsyncpa [#allocation4], 1 }
 0x234   :  { %648 = vsyncpa [#allocation7], 1 }
 0x235   :  { %649 = vsyncpa [#allocation5], 1 }

</bundles_post_ra>
